<compile_context>
chip_gen: v6e
topology: v6e:2x2x1
jax: 0.10.0
libtpu: 0.0.40
codegen_flags: <defaults>
</compile_context>

<pallas_src>
import functools

import jax
import jax.numpy as jnp
from jax.experimental import pallas as pl
from jax.experimental.pallas import tpu as pltpu


LANE = 128                         # lane-dense channel padding
VMEM_BUDGET = 24 * 1024 * 1024     # conservative (fits v7x 32 MiB scoped default)
VMEM_LIMIT_BYTES = 48 * 1024 * 1024  # raise v5e's 16 MiB default; < v7x 64 MiB phys


def _round_up(x, m):
    return (x + m - 1) // m * m


def _choose_tiles(n):
    """Adaptive padding + tile sizes. Returns (n_pad, tm, tk) with tm|n_pad, tk|n_pad."""
    if n <= 256:
        n_pad = 256
    else:
        n_pad = _round_up(n, 512)
    # Row tile: as large as possible but keep >= 2 row tiles when N allows
    # (so the "parallel" axis load-balances across v7x's two TensorCores).
    tm = min(512, max(256, n_pad // 2))
    # Reduction tile: largest of {2048, 1024, 512, 256} dividing n_pad.
    tk = 256
    for cand in (2048, 1024, 512):
        if n_pad % cand == 0:
            tk = cand
            break
    return n_pad, tm, tk


def _vmem_estimate(n_pad, c_pad, tm, tk, xw_resident):
    a = 2 * tm * tk * 2                                   # double-buffered A tile (bf16)
    xw = 2 * (n_pad if xw_resident else tk) * c_pad * 2   # XW (bf16)
    out = 2 * tm * c_pad * 4                              # output / accumulator (f32)
    bias = 2 * c_pad * 4
    return a + xw + out + bias


# ----------------------------- Pallas kernel ------------------------------- #
def gcn_agg_kernel(a_ref, xw_ref, b_ref, o_ref, *, xw_resident):
    """One (row-tile i, reduction-tile k) step of  out = relu(A @ XW + b).

    Accumulates directly into the resident f32 output block (no scratch)."""
    k = pl.program_id(1)

    @pl.when(k == 0)
    def _():
        o_ref[...] = jnp.zeros_like(o_ref)

    if xw_resident:
        # Whole XW lives in VMEM; take the k-th (tk, Cp) chunk.
        tk = a_ref.shape[1]
        start = pl.multiple_of(k * tk, tk)
        xw_tile = xw_ref[pl.ds(start, tk), :]
    else:
        xw_tile = xw_ref[...]

    o_ref[...] += jnp.dot(a_ref[...], xw_tile,
                          preferred_element_type=jnp.float32)

    @pl.when(k == pl.num_programs(1) - 1)
    def _():
        o_ref[...] = jnp.maximum(o_ref[...] + b_ref[...], 0.0)


def gcn_aggregate_pallas(adj, xw, bias2d, *, tm, tk, xw_resident):
    """adj: [Np, Np] bf16, xw: [Np, Cp] bf16, bias2d: [1, Cp] f32 -> [Np, Cp] f32."""
    n_pad = adj.shape[0]
    c_pad = xw.shape[1]
    assert n_pad % tm == 0 and n_pad % tk == 0 and c_pad % LANE == 0

    if xw_resident:
        # Constant block index -> fetched into VMEM once for the entire grid.
        xw_spec = pl.BlockSpec((n_pad, c_pad), lambda i, k: (0, 0))
    else:
        xw_spec = pl.BlockSpec((tk, c_pad), lambda i, k: (k, 0))

    kernel = functools.partial(gcn_agg_kernel, xw_resident=xw_resident)

    return pl.pallas_call(
        kernel,
        out_shape=jax.ShapeDtypeStruct((n_pad, c_pad), jnp.float32),
        grid_spec=pltpu.PrefetchScalarGridSpec(
            num_scalar_prefetch=0,
            grid=(n_pad // tm, n_pad // tk),               # reduction axis last
            in_specs=[
                pl.BlockSpec((tm, tk), lambda i, k: (i, k)),    # A tile
                xw_spec,                                        # XW (resident or blocked)
                pl.BlockSpec((1, c_pad), lambda i, k: (0, 0)),  # bias (resident)
            ],
            out_specs=pl.BlockSpec((tm, c_pad), lambda i, k: (i, 0)),  # resident accumulator
        ),
        compiler_params=pltpu.CompilerParams(
            dimension_semantics=("parallel", "arbitrary"),
            vmem_limit_bytes=VMEM_LIMIT_BYTES,
        ),
    )(adj, xw, bias2d)


# ------------------------------- Module glue ------------------------------- #
def build_normalized_adjacency_padded(edge_index, edge_weight, num_nodes, n_pad,
                                      out_dtype=jnp.bfloat16):
    """Dense \\hat{A} = D^{-1/2}(A + I)D^{-1/2} as A[dst, src], scattered directly
    into a pre-padded [n_pad, n_pad] buffer (f32 scatter-add, single cast)."""
    ar = jnp.arange(num_nodes, dtype=edge_index.dtype)
    row = jnp.concatenate([edge_index[0], ar])                       # sources
    col = jnp.concatenate([edge_index[1], ar])                       # targets
    ew = jnp.concatenate([edge_weight.astype(jnp.float32),
                          jnp.ones((num_nodes,), jnp.float32)])
    deg = jnp.zeros((num_nodes,), jnp.float32).at[col].add(ew)       # in-degree
    dinv = jnp.where(deg > 0.0, jax.lax.rsqrt(deg), 0.0)
    norm = dinv[row] * ew * dinv[col]
    adj = jnp.zeros((n_pad, n_pad), jnp.float32).at[col, row].add(norm)
    return adj.astype(out_dtype)


@jax.jit
def directional_gnn_block_forward(x, edge_index, edge_weight, weight, bias):
    """Equivalent of DirectionalGraphNeuralNetworkBlock.forward."""
    x = x.astype(jnp.float32)
    n, _ = x.shape
    c_out = weight.shape[0]

    n_pad, tm, tk = _choose_tiles(n)
    c_pad = _round_up(max(c_out, LANE), LANE)

    # Keep XW fully VMEM-resident whenever the whole pipeline fits the budget.
    xw_resident = _vmem_estimate(n_pad, c_pad, tm, tk, True) <= VMEM_BUDGET

    adj_p = build_normalized_adjacency_padded(edge_index, edge_weight, n, n_pad,
                                              jnp.bfloat16)            # [Np, Np] bf16

    # Projection hoisted out of the hot loop (tiny vs N^2*C_out aggregation).
    xw = x @ weight.T.astype(jnp.float32)                              # [N, C_out] f32
    xw_p = jnp.pad(xw, ((0, n_pad - n), (0, c_pad - c_out))).astype(jnp.bfloat16)
    b_p = jnp.pad(bias.astype(jnp.float32), (0, c_pad - c_out)).reshape(1, c_pad)

    out = gcn_aggregate_pallas(adj_p, xw_p, b_p, tm=tm, tk=tk,
                               xw_resident=xw_resident)                # [Np, Cp] f32
    return out[:n, :c_out]


# ------------------------------- References -------------------------------- #
def reference_forward_f32(x, edge_index, edge_weight, weight, bias):
    x = x.astype(jnp.float32)
    n = x.shape[0]
    adj = build_normalized_adjacency_padded(edge_index, edge_weight, n, n,
                                            jnp.float32)
    out = adj @ (x @ weight.T) + bias[None, :]
    return jnp.maximum(out, 0.0)


def reference_forward_bf16_quantized(x, edge_index, edge_weight, weight, bias):
    """Same math, but with adjacency / projection quantized to bf16 exactly as
    the kernel does (isolates kernel arithmetic from the bf16 cast)."""
    x = x.astype(jnp.float32)
    n = x.shape[0]
    adj = build_normalized_adjacency_padded(edge_index, edge_weight, n, n,
                                            jnp.float32)
    adj_q = adj.astype(jnp.bfloat16).astype(jnp.float32)
    xw_q = (x @ weight.T).astype(jnp.bfloat16).astype(jnp.float32)
    out = adj_q @ xw_q + bias[None, :]
    return jnp.maximum(out, 0.0)


# --------------------------------- Driver ----------------------------------- #
def _make_case(key, n, c_in, c_out, e):
    k_x, k_src, k_off, k_ew, k_w = jax.random.split(key, 5)
    x = jax.random.normal(k_x, (n, c_in), dtype=jnp.float32)
    # random directed edges with no self loops (dst = src + offset mod n, offset>=1)
    src = jax.random.randint(k_src, (e,), 0, n, dtype=jnp.int32)
    off = jax.random.randint(k_off, (e,), 1, n, dtype=jnp.int32)
    dst = (src + off) % n
    edge_index = jnp.stack([src, dst], axis=0)                        # [2, E]
    edge_weight = jax.random.uniform(k_ew, (e,), dtype=jnp.float32) + 0.1
    # GCNConv-style params: glorot weight [out, in], zero bias
    limit = (6.0 / (c_in + c_out)) ** 0.5
    weight = jax.random.uniform(k_w, (c_out, c_in), jnp.float32, -limit, limit)
    bias = jnp.zeros((c_out,), jnp.float32)
    return x, edge_index, edge_weight, weight, bias


def _check_case(args, atol_q, rtol_q):
    x, edge_index, edge_weight, weight, bias = args
    out = directional_gnn_block_forward(x, edge_index, edge_weight, weight, bias)
    out = jax.block_until_ready(out)
    assert out.shape == (x.shape[0], weight.shape[0])
    # Kernel arithmetic matches the bf16-quantized reference tightly...
    ref_q = reference_forward_bf16_quantized(x, edge_index, edge_weight, weight, bias)
    assert jnp.allclose(out, ref_q, atol=atol_q, rtol=rtol_q)
    # ...and the full-f32 reference within bf16 tolerance.
    ref = reference_forward_f32(x, edge_index, edge_weight, weight, bias)
    assert jnp.allclose(out, ref, atol=5e-2, rtol=5e-2)


if __name__ == "__main__":
    key = jax.random.PRNGKey(0)
    k_small, k_big = jax.random.split(key, 2)

    # Small case (matches the module's typical small-graph usage): single grid step.
    _check_case(_make_case(k_small, n=16, c_in=8, c_out=16, e=32),
                atol_q=1e-4, rtol_q=1e-4)

    # Moderate case: exercises multi row-tile (parallel axis) and the multi-step
    # reduction with the VMEM-resident XW dynamic slice path.
    _check_case(_make_case(k_big, n=1100, c_in=8, c_out=16, e=4096),
                atol_q=2e-3, rtol_q=2e-3)

    print("KERNEL_OK")
</pallas_src>

<mosaic_0001>
module attributes {stable_mosaic.version = 11 : i64} {
  func.func private @main(%arg0: i32) attributes {dimension_semantics = [#tpu.dimension_semantics<core_parallel>], iteration_bounds = array<i64: 2>, tpu.core_type = #tpu.core_type<sc_scalar_subcore>, window_params = []} {
    return
  }
}

module attributes {stable_mosaic.version = 11 : i64} {
  func.func private @main(%arg0: i32) attributes {dimension_semantics = [#tpu.dimension_semantics<core_parallel>], iteration_bounds = array<i64: 2>, tpu.core_type = #tpu.core_type<sc_scalar_subcore>, window_params = []} {
    return
  }
}

module attributes {stable_mosaic.version = 11 : i64} {
  func.func @gcn_agg_kernel(%arg0: i32, %arg1: i32, %arg2: memref<256x256xbf16, #tpu.memory_space<vmem>>, %arg3: memref<256x128xbf16, #tpu.memory_space<vmem>>, %arg4: memref<1x128xf32, #tpu.memory_space<vmem>>, %arg5: memref<256x128xf32, #tpu.memory_space<vmem>>) attributes {dimension_semantics = [#tpu.dimension_semantics<parallel>, #tpu.dimension_semantics<arbitrary>], iteration_bounds = array<i64: 1, 1>, scalar_prefetch = 0 : i64, scratch_operands = 0 : i64, tpu.core_type = #tpu.core_type<tc>, window_params = [{transform_indices = @transform_0, window_bounds = array<i64: 256, 256>}, {pipeline_mode = #tpu.pipeline_mode<synchronous>, transform_indices = @transform_1, window_bounds = array<i64: 256, 128>}, {pipeline_mode = #tpu.pipeline_mode<synchronous>, transform_indices = @transform_2, window_bounds = array<i64: 1, 128>}, {transform_indices = @transform_3, window_bounds = array<i64: 256, 128>}]} {
    %c0_i32 = arith.constant 0 : i32
    %0 = arith.cmpi eq, %arg1, %c0_i32 : i32
    %1 = arith.extui %0 : i1 to i32
    %c0_i32_0 = arith.constant 0 : i32
    %2 = arith.cmpi ne, %1, %c0_i32_0 : i32
    scf.if %2 {
      %cst_9 = arith.constant 0.000000e+00 : f32
      %15 = vector.broadcast %cst_9 : f32 to vector<256x128xf32>
      %c0_10 = arith.constant 0 : index
      %c0_11 = arith.constant 0 : index
      %16 = vector.load %arg5[%c0_10, %c0_11] : memref<256x128xf32, #tpu.memory_space<vmem>>, vector<256x128xf32>
      tpu.vector_store %arg5[%c0_10, %c0_11], %15 {strides = array<i32>} : memref<256x128xf32, #tpu.memory_space<vmem>>, vector<256x128xf32>,
    } else {
    }
    %c256_i32 = arith.constant 256 : i32
    %3 = arith.muli %arg1, %c256_i32 : i32
    %4 = tpu.assume_multiple %3, 256 : i32
    %5 = arith.index_cast %4 : i32 to index
    %c0 = arith.constant 0 : index
    %6 = vector.load %arg3[%5, %c0] : memref<256x128xbf16, #tpu.memory_space<vmem>>, vector<256x128xbf16>
    %c0_1 = arith.constant 0 : index
    %c0_2 = arith.constant 0 : index
    %7 = vector.load %arg5[%c0_1, %c0_2] : memref<256x128xf32, #tpu.memory_space<vmem>>, vector<256x128xf32>
    %c0_3 = arith.constant 0 : index
    %c0_4 = arith.constant 0 : index
    %8 = vector.load %arg2[%c0_3, %c0_4] : memref<256x256xbf16, #tpu.memory_space<vmem>>, vector<256x256xbf16>
    %cst = arith.constant dense<0.000000e+00> : vector<256x128xf32>
    %9 = tpu.matmul %8, %6, %cst {dimension_numbers = #tpu.dot_dimension_numbers<[1], [0], [0], [1], [0, 0, 1, 1], [], []>} : vector<256x256xbf16>, vector<256x128xbf16>, vector<256x128xf32> -> vector<256x128xf32>
    %10 = arith.addf %7, %9 : vector<256x128xf32>
    %c0_5 = arith.constant 0 : index
    %c0_6 = arith.constant 0 : index
    %11 = vector.load %arg5[%c0_5, %c0_6] : memref<256x128xf32, #tpu.memory_space<vmem>>, vector<256x128xf32>
    tpu.vector_store %arg5[%c0_5, %c0_6], %10 {strides = array<i32>} : memref<256x128xf32, #tpu.memory_space<vmem>>, vector<256x128xf32>,
    %c0_i32_7 = arith.constant 0 : i32
    %12 = arith.cmpi eq, %arg1, %c0_i32_7 : i32
    %13 = arith.extui %12 : i1 to i32
    %c0_i32_8 = arith.constant 0 : i32
    %14 = arith.cmpi ne, %13, %c0_i32_8 : i32
    scf.if %14 {
      %c0_9 = arith.constant 0 : index
      %c0_10 = arith.constant 0 : index
      %15 = vector.load %arg5[%c0_9, %c0_10] : memref<256x128xf32, #tpu.memory_space<vmem>>, vector<256x128xf32>
      %c0_11 = arith.constant 0 : index
      %c0_12 = arith.constant 0 : index
      %16 = vector.load %arg4[%c0_11, %c0_12] : memref<1x128xf32, #tpu.memory_space<vmem>>, vector<1x128xf32>
      %17 = vector.broadcast %16 : vector<1x128xf32> to vector<256x128xf32>
      %18 = arith.addf %15, %17 : vector<256x128xf32>
      %cst_13 = arith.constant 0.000000e+00 : f32
      %19 = vector.broadcast %cst_13 : f32 to vector<256x128xf32>
      %20 = arith.maximumf %18, %19 : vector<256x128xf32>
      %c0_14 = arith.constant 0 : index
      %c0_15 = arith.constant 0 : index
      %21 = vector.load %arg5[%c0_14, %c0_15] : memref<256x128xf32, #tpu.memory_space<vmem>>, vector<256x128xf32>
      tpu.vector_store %arg5[%c0_14, %c0_15], %20 {strides = array<i32>} : memref<256x128xf32, #tpu.memory_space<vmem>>, vector<256x128xf32>,
    } else {
    }
    return
  }
  func.func @transform_0(%arg0: i32, %arg1: i32) -> (i32, i32) {
    %c0_i32 = arith.constant 0 : i32
    return %arg0, %arg1 : i32, i32
  }
  func.func @transform_1(%arg0: i32, %arg1: i32) -> (i32, i32) {
    %c0_i32 = arith.constant 0 : i32
    %c0_i32_0 = arith.constant 0 : i32
    %c0_i32_1 = arith.constant 0 : i32
    return %c0_i32, %c0_i32_0 : i32, i32
  }
  func.func @transform_2(%arg0: i32, %arg1: i32) -> (i32, i32) {
    %c0_i32 = arith.constant 0 : i32
    %c0_i32_0 = arith.constant 0 : i32
    %c0_i32_1 = arith.constant 0 : i32
    return %c0_i32, %c0_i32_0 : i32, i32
  }
  func.func @transform_3(%arg0: i32, %arg1: i32) -> (i32, i32) {
    %c0_i32 = arith.constant 0 : i32
    %c0_i32_0 = arith.constant 0 : i32
    return %arg0, %c0_i32 : i32, i32
  }
}

</mosaic_0001>

<bundles_post_ra>
// kernel: directional_gnn_block_forward.1
= control target key start
LH: loop header
LB: loop body
LE: loop exit
PB: predicated region body
PF: predicated region fallthrough
CT: control target
= control target key end

     0   :  { %s1316_s1 = inlined_call_operand.vmem [shape: bf16[256,128], index: 1, kind: input, shape index: {}]   ;;  %s1317_s0 = inlined_call_operand.vmem [shape: bf16[256,256], index: 0, kind: input, shape index: {}]   ;;  %s1318_s2 = inlined_call_operand.vmem [shape: f32[1,128], index: 2, kind: input, shape index: {}]   ;;  %s1319_s3 = inlined_call_operand.vmem [shape: f32[256,128], index: 3, kind: output, shape index: {}]  }
   0x1   :  { %v955_v0 = vld [vmem:[%s1316_s1 + $0x78] sm:$0xff]   ;;  %v957_v2 = vld [vmem:[%s1316_s1 + $0x70] sm:$0xff]   ;;  %v959_v4 = vld [vmem:[%s1316_s1 + $0x68] sm:$0xff]  }
   0x2   :  { %v956_v1 = vld [vmem:[%s1316_s1 + $0x38] sm:$0xff]   ;;  %826 = vmatprep.subr.bf16.mxu0 %v955_v0  ;;  %938 = vmatprep.subr.bf16.mxu1 %v955_v0  ;;  %v958_v3 = vld [vmem:[%s1316_s1 + $0x30] sm:$0xff]   ;;  %v960_v5 = vld [vmem:[%s1316_s1 + $0x28] sm:$0xff]  }
   0x3   :  { %827 = vmatpush3.bf16.msra.mxu0 %v956_v1  ;;  %946 = vmatpush3.bf16.msra.mxu1 %v956_v1  ;;  %v961_v6 = vld [vmem:[%s1316_s1 + $0x60] sm:$0xff]   ;;  %v963_v8 = vld [vmem:[%s1316_s1 + $0x58] sm:$0xff]   ;;  %v965_v10 = vld [vmem:[%s1316_s1 + $0x50] sm:$0xff]  }
   0x4   :  { %828 = vmatprep.subr.bf16.mxu0 %v957_v2  ;;  %939 = vmatprep.subr.bf16.mxu1 %v957_v2  ;;  %v962_v7 = vld [vmem:[%s1316_s1 + $0x20] sm:$0xff]   ;;  %v964_v9 = vld [vmem:[%s1316_s1 + $0x18] sm:$0xff]   ;;  %v966_v13 = vld [vmem:[%s1316_s1 + $0x10] sm:$0xff]  }
   0x5   :  { %v973_v11 = vld [vmem:[%s1317_s0 + $0x4] ss:$8 sps:$4 sm:$0xff]   ;;  %v971_v18 = vld [vmem:[%s1317_s0] ss:$8 sps:$4 sm:$0xff]   ;;  %v977_v20 = vld [vmem:[%s1317_s0 + $0x14] ss:$8 sps:$4 sm:$0xff]  }
   0x6   :  { %v976_v12 = vld [vmem:[%s1317_s0 + $0x84] ss:$8 sps:$4 sm:$0xff]   ;;  %440 = vmatprep.mubr.bf16.mxu0 %v973_v11  ;;  %v974_v19 = vld [vmem:[%s1317_s0 + $0x80] ss:$8 sps:$4 sm:$0xff]   ;;  %v979_v21 = vld [vmem:[%s1317_s0 + $0x94] ss:$8 sps:$4 sm:$0xff]  }
   0x7   :  { %829 = vmatpush3.bf16.msra.mxu0 %v958_v3  ;;  %947 = vmatpush3.bf16.msra.mxu1 %v958_v3  ;;  %v967_v14 = vld [vmem:[%s1316_s1 + $0x48] sm:$0xff]   ;;  %v969_v16 = vld [vmem:[%s1316_s1 + $0x40] sm:$0xff]   ;;  %v981_v22 = vld [vmem:[%s1317_s0 + $0x10] ss:$8 sps:$4 sm:$0xff]  }
   0x8   :  { %830 = vmatprep.subr.bf16.mxu0 %v959_v4  ;;  %940 = vmatprep.subr.bf16.mxu1 %v959_v4  ;;  %v968_v15 = vld [vmem:[%s1316_s1 + $0x8] sm:$0xff]   ;;  %v970_v17 = vld [vmem:[%s1316_s1] sm:$0xff]   ;;  %v982_v23 = vld [vmem:[%s1317_s0 + $0x90] ss:$8 sps:$4 sm:$0xff]  }
   0x9   :  { %504 = vmatprep.mubr.bf16.mxu1 %v976_v12  ;;  %v983_v24 = vld [vmem:[%s1317_s0 + $0x24] ss:$8 sps:$4 sm:$0xff]   ;;  %v987_v26 = vld [vmem:[%s1317_s0 + $0x20] ss:$8 sps:$4 sm:$0xff]   ;;  %v989_v28 = vld [vmem:[%s1317_s0 + $0x34] ss:$8 sps:$4 sm:$0xff]  }
   0xa   :  { %v985_v25 = vld [vmem:[%s1317_s0 + $0xa4] ss:$8 sps:$4 sm:$0xff]   ;;  %v988_v27 = vld [vmem:[%s1317_s0 + $0xa0] ss:$8 sps:$4 sm:$0xff]   ;;  %v991_v29 = vld [vmem:[%s1317_s0 + $0xb4] ss:$8 sps:$4 sm:$0xff]  }
   0xb   :  { %831 = vmatpush3.bf16.msra.mxu0 %v960_v5  ;;  %948 = vmatpush3.bf16.msra.mxu1 %v960_v5  ;;  %v993_v30 = vld [vmem:[%s1317_s0 + $0x30] ss:$8 sps:$4 sm:$0xff]   ;;  %v995_v32 = vld [vmem:[%s1317_s0 + $0x44] ss:$8 sps:$4 sm:$0xff]   ;;  %v999_v34 = vld [vmem:[%s1317_s0 + $0x40] ss:$8 sps:$4 sm:$0xff]  }
   0xc   :  { %832 = vmatprep.subr.bf16.mxu0 %v961_v6  ;;  %941 = vmatprep.subr.bf16.mxu1 %v961_v6  ;;  %v994_v31 = vld [vmem:[%s1317_s0 + $0xb0] ss:$8 sps:$4 sm:$0xff]   ;;  %v997_v33 = vld [vmem:[%s1317_s0 + $0xc4] ss:$8 sps:$4 sm:$0xff]   ;;  %v1000_v35 = vld [vmem:[%s1317_s0 + $0xc0] ss:$8 sps:$4 sm:$0xff]  }
   0xd   :  { %v1001_v36 = vld [vmem:[%s1317_s0 + $0x54] ss:$8 sps:$4 sm:$0xff]   ;;  %v1005_v38 = vld [vmem:[%s1317_s0 + $0x50] ss:$8 sps:$4 sm:$0xff]   ;;  %v1007_v40 = vld [vmem:[%s1317_s0 + $0x64] ss:$8 sps:$4 sm:$0xff]  }
   0xe   :  { %v1003_v37 = vld [vmem:[%s1317_s0 + $0xd4] ss:$8 sps:$4 sm:$0xff]   ;;  %v1006_v39 = vld [vmem:[%s1317_s0 + $0xd0] ss:$8 sps:$4 sm:$0xff]   ;;  %v1009_v41 = vld [vmem:[%s1317_s0 + $0xe4] ss:$8 sps:$4 sm:$0xff]  }
   0xf   :  { %833 = vmatpush3.bf16.msra.mxu0 %v962_v7  ;;  %949 = vmatpush3.bf16.msra.mxu1 %v962_v7  ;;  %v1011_v42 = vld [vmem:[%s1317_s0 + $0x60] ss:$8 sps:$4 sm:$0xff]   ;;  %v1013_v44 = vld [vmem:[%s1317_s0 + $0x74] ss:$8 sps:$4 sm:$0xff]   ;;  %v1017_v46 = vld [vmem:[%s1317_s0 + $0x70] ss:$8 sps:$4 sm:$0xff]  }
  0x10   :  { %834 = vmatprep.subr.bf16.mxu0 %v963_v8  ;;  %942 = vmatprep.subr.bf16.mxu1 %v963_v8  ;;  %v1012_v43 = vld [vmem:[%s1317_s0 + $0xe0] ss:$8 sps:$4 sm:$0xff]   ;;  %v1015_v45 = vld [vmem:[%s1317_s0 + $0xf4] ss:$8 sps:$4 sm:$0xff]   ;;  %v1018_v47 = vld [vmem:[%s1317_s0 + $0xf0] ss:$8 sps:$4 sm:$0xff]  }
  0x11   :  { %v1186_v54 = vld [vmem:[%s1318_s2] ss:$0 sm:$0xff] }
  0x13   :  { %835 = vmatpush3.bf16.msra.mxu0 %v964_v9  ;;  %950 = vmatpush3.bf16.msra.mxu1 %v964_v9 }
  0x14   :  { %836 = vmatprep.subr.bf16.mxu0 %v965_v10  ;;  %943 = vmatprep.subr.bf16.mxu1 %v965_v10 }
  0x17   :  { %837 = vmatpush3.bf16.msra.mxu0 %v966_v13  ;;  %951 = vmatpush3.bf16.msra.mxu1 %v966_v13 }
  0x18   :  { %838 = vmatprep.subr.bf16.mxu0 %v967_v14  ;;  %944 = vmatprep.subr.bf16.mxu1 %v967_v14 }
  0x1b   :  { %839 = vmatpush3.bf16.msra.mxu0 %v968_v15  ;;  %952 = vmatpush3.bf16.msra.mxu1 %v968_v15 }
  0x1c   :  { %840 = vmatprep.subr.bf16.mxu0 %v969_v16  ;;  %945 = vmatprep.subr.bf16.mxu1 %v969_v16 }
  0x1f   :  { %841 = vmatpush3.bf16.msra.mxu0 %v970_v17  ;;  %953 = vmatpush3.bf16.msra.mxu1 %v970_v17 }
  0x22   :  { %441 = vmatmul.mubr.bf16.vlgmr.msra.gmra.mxu0 %v971_v18  ;;  %505 = vmatmul.mubr.bf16.vlgmr.msra.gmra.mxu1 %v974_v19 }
  0x23   :  { %448 = vmatprep.mubr.bf16.mxu0 %v977_v20  ;;  %512 = vmatprep.mubr.bf16.mxu1 %v979_v21 }
  0x2a   :  { %449 = vmatmul.mubr.bf16.gmra.mxu0 %v981_v22  ;;  %513 = vmatmul.mubr.bf16.gmra.mxu1 %v982_v23 }
  0x2b   :  { %456 = vmatprep.mubr.bf16.mxu0 %v983_v24  ;;  %520 = vmatprep.mubr.bf16.mxu1 %v985_v25 }
  0x32   :  { %457 = vmatmul.mubr.bf16.gmra.mxu0 %v987_v26  ;;  %521 = vmatmul.mubr.bf16.gmra.mxu1 %v988_v27 }
  0x33   :  { %464 = vmatprep.mubr.bf16.mxu0 %v989_v28  ;;  %528 = vmatprep.mubr.bf16.mxu1 %v991_v29 }
  0x3a   :  { %465 = vmatmul.mubr.bf16.gmra.mxu0 %v993_v30  ;;  %529 = vmatmul.mubr.bf16.gmra.mxu1 %v994_v31 }
  0x3b   :  { %472 = vmatprep.mubr.bf16.mxu0 %v995_v32  ;;  %536 = vmatprep.mubr.bf16.mxu1 %v997_v33 }
  0x42   :  { %473 = vmatmul.mubr.bf16.gmra.mxu0 %v999_v34  ;;  %537 = vmatmul.mubr.bf16.gmra.mxu1 %v1000_v35 }
  0x43   :  { %480 = vmatprep.mubr.bf16.mxu0 %v1001_v36  ;;  %544 = vmatprep.mubr.bf16.mxu1 %v1003_v37 }
  0x4a   :  { %481 = vmatmul.mubr.bf16.gmra.mxu0 %v1005_v38  ;;  %545 = vmatmul.mubr.bf16.gmra.mxu1 %v1006_v39 }
  0x4b   :  { %488 = vmatprep.mubr.bf16.mxu0 %v1007_v40  ;;  %552 = vmatprep.mubr.bf16.mxu1 %v1009_v41 }
  0x52   :  { %489 = vmatmul.mubr.bf16.gmra.mxu0 %v1011_v42  ;;  %553 = vmatmul.mubr.bf16.gmra.mxu1 %v1012_v43 }
  0x53   :  { %496 = vmatprep.mubr.bf16.mxu0 %v1013_v44  ;;  %560 = vmatprep.mubr.bf16.mxu1 %v1015_v45 }
  0x5a   :  { %497 = vmatmul.mubr.bf16.gmra.mxu0 %v1017_v46  ;;  %561 = vmatmul.mubr.bf16.gmra.mxu1 %v1018_v47 }
  0xe2   :  { %v842_v48 = vpop.f32.mrf.mxu0  ;;  %v890_v49 = vpop.f32.mrf.mxu1 }
  0xe4   :  { %v843_v50 = vpop.f32.mrf.mxu0  ;;  %v891_v51 = vpop.f32.mrf.mxu1 }
  0xe5   :  { %v844_v52 = vadd.f32 %v843_v50, %v842_v48  ;;  %v892_v53 = vadd.f32 %v891_v51, %v890_v49 }
  0xe6   :  { %v845_v55 = vpop.f32.mrf.mxu0  ;;  %v893_v56 = vpop.f32.mrf.mxu1 }
  0xe7   :  { %v675_v59 = vadd.f32 %v844_v52, %v1186_v54  ;;  %v691_v60 = vadd.f32 %v892_v53, %v1186_v54 }
  0xe8   :  { %v846_v57 = vpop.f32.mrf.mxu0  ;;  %v894_v58 = vpop.f32.mrf.mxu1 }
  0xe9   :  { %v847_v61 = vadd.f32 %v846_v57, %v845_v55  ;;  %v895_v62 = vadd.f32 %v894_v58, %v893_v56  ;;  %v707_v1 = vmax.f32 %v675_v59, 0.0  ;;  %v723_v2 = vmax.f32 %v691_v60, 0.0 }
  0xea   :  { %v848_v63 = vpop.f32.mrf.mxu0  ;;  %v896_v0 = vpop.f32.mrf.mxu1 }
  0xeb   :  { %739 = vst [vmem:[%s1319_s3] sm:$0xff] %v707_v1  ;;  %755 = vst [vmem:[%s1319_s3 + $0x80] sm:$0xff] %v723_v2  ;;  %v676_v5 = vadd.f32 %v847_v61, %v1186_v54  ;;  %v692_v6 = vadd.f32 %v895_v62, %v1186_v54 }
  0xec   :  { %v849_v3 = vpop.f32.mrf.mxu0  ;;  %v897_v4 = vpop.f32.mrf.mxu1 }
  0xed   :  { %v850_v7 = vadd.f32 %v849_v3, %v848_v63  ;;  %v898_v8 = vadd.f32 %v897_v4, %v896_v0  ;;  %v708_v11 = vmax.f32 %v676_v5, 0.0  ;;  %v724_v12 = vmax.f32 %v692_v6, 0.0 }
  0xee   :  { %v851_v9 = vpop.f32.mrf.mxu0  ;;  %v899_v10 = vpop.f32.mrf.mxu1 }
  0xef   :  { %740 = vst [vmem:[%s1319_s3 + $0x8] sm:$0xff] %v708_v11  ;;  %756 = vst [vmem:[%s1319_s3 + $0x88] sm:$0xff] %v724_v12  ;;  %v677_v15 = vadd.f32 %v850_v7, %v1186_v54  ;;  %v693_v16 = vadd.f32 %v898_v8, %v1186_v54 }
  0xf0   :  { %v852_v13 = vpop.f32.mrf.mxu0  ;;  %v900_v14 = vpop.f32.mrf.mxu1 }
  0xf1   :  { %v853_v17 = vadd.f32 %v852_v13, %v851_v9  ;;  %v901_v18 = vadd.f32 %v900_v14, %v899_v10  ;;  %v709_v21 = vmax.f32 %v677_v15, 0.0  ;;  %v725_v22 = vmax.f32 %v693_v16, 0.0 }
  0xf2   :  { %v854_v19 = vpop.f32.mrf.mxu0  ;;  %v902_v20 = vpop.f32.mrf.mxu1 }
  0xf3   :  { %741 = vst [vmem:[%s1319_s3 + $0x10] sm:$0xff] %v709_v21  ;;  %757 = vst [vmem:[%s1319_s3 + $0x90] sm:$0xff] %v725_v22  ;;  %v678_v25 = vadd.f32 %v853_v17, %v1186_v54  ;;  %v694_v26 = vadd.f32 %v901_v18, %v1186_v54 }
  0xf4   :  { %v855_v23 = vpop.f32.mrf.mxu0  ;;  %v903_v24 = vpop.f32.mrf.mxu1 }
  0xf5   :  { %v856_v27 = vadd.f32 %v855_v23, %v854_v19  ;;  %v904_v28 = vadd.f32 %v903_v24, %v902_v20  ;;  %v710_v31 = vmax.f32 %v678_v25, 0.0  ;;  %v726_v32 = vmax.f32 %v694_v26, 0.0 }
  0xf6   :  { %v857_v29 = vpop.f32.mrf.mxu0  ;;  %v905_v30 = vpop.f32.mrf.mxu1 }
  0xf7   :  { %742 = vst [vmem:[%s1319_s3 + $0x18] sm:$0xff] %v710_v31  ;;  %758 = vst [vmem:[%s1319_s3 + $0x98] sm:$0xff] %v726_v32  ;;  %v679_v35 = vadd.f32 %v856_v27, %v1186_v54  ;;  %v695_v36 = vadd.f32 %v904_v28, %v1186_v54 }
  0xf8   :  { %v858_v33 = vpop.f32.mrf.mxu0  ;;  %v906_v34 = vpop.f32.mrf.mxu1 }
  0xf9   :  { %v859_v37 = vadd.f32 %v858_v33, %v857_v29  ;;  %v907_v38 = vadd.f32 %v906_v34, %v905_v30  ;;  %v711_v41 = vmax.f32 %v679_v35, 0.0  ;;  %v727_v42 = vmax.f32 %v695_v36, 0.0 }
  0xfa   :  { %v860_v39 = vpop.f32.mrf.mxu0  ;;  %v908_v40 = vpop.f32.mrf.mxu1 }
  0xfb   :  { %743 = vst [vmem:[%s1319_s3 + $0x20] sm:$0xff] %v711_v41  ;;  %759 = vst [vmem:[%s1319_s3 + $0xa0] sm:$0xff] %v727_v42  ;;  %v680_v45 = vadd.f32 %v859_v37, %v1186_v54  ;;  %v696_v46 = vadd.f32 %v907_v38, %v1186_v54 }
  0xfc   :  { %v861_v43 = vpop.f32.mrf.mxu0  ;;  %v909_v44 = vpop.f32.mrf.mxu1 }
  0xfd   :  { %v862_v47 = vadd.f32 %v861_v43, %v860_v39  ;;  %v910_v48 = vadd.f32 %v909_v44, %v908_v40  ;;  %v712_v51 = vmax.f32 %v680_v45, 0.0  ;;  %v728_v52 = vmax.f32 %v696_v46, 0.0 }
  0xfe   :  { %v863_v49 = vpop.f32.mrf.mxu0  ;;  %v911_v50 = vpop.f32.mrf.mxu1 }
  0xff   :  { %744 = vst [vmem:[%s1319_s3 + $0x28] sm:$0xff] %v712_v51  ;;  %760 = vst [vmem:[%s1319_s3 + $0xa8] sm:$0xff] %v728_v52  ;;  %v681_v56 = vadd.f32 %v862_v47, %v1186_v54  ;;  %v697_v57 = vadd.f32 %v910_v48, %v1186_v54 }
 0x100   :  { %v864_v53 = vpop.f32.mrf.mxu0  ;;  %v912_v55 = vpop.f32.mrf.mxu1 }
 0x101   :  { %v865_v58 = vadd.f32 %v864_v53, %v863_v49  ;;  %v913_v59 = vadd.f32 %v912_v55, %v911_v50  ;;  %v713_v62 = vmax.f32 %v681_v56, 0.0  ;;  %v729_v63 = vmax.f32 %v697_v57, 0.0 }
 0x102   :  { %v866_v60 = vpop.f32.mrf.mxu0  ;;  %v914_v61 = vpop.f32.mrf.mxu1 }
 0x103   :  { %745 = vst [vmem:[%s1319_s3 + $0x30] sm:$0xff] %v713_v62  ;;  %761 = vst [vmem:[%s1319_s3 + $0xb0] sm:$0xff] %v729_v63  ;;  %v682_v2 = vadd.f32 %v865_v58, %v1186_v54  ;;  %v698_v3 = vadd.f32 %v913_v59, %v1186_v54 }
 0x104   :  { %v867_v0 = vpop.f32.mrf.mxu0  ;;  %v915_v1 = vpop.f32.mrf.mxu1 }
 0x105   :  { %v868_v4 = vadd.f32 %v867_v0, %v866_v60  ;;  %v916_v5 = vadd.f32 %v915_v1, %v914_v61  ;;  %v714_v8 = vmax.f32 %v682_v2, 0.0  ;;  %v730_v9 = vmax.f32 %v698_v3, 0.0 }
 0x106   :  { %v869_v6 = vpop.f32.mrf.mxu0  ;;  %v917_v7 = vpop.f32.mrf.mxu1 }
 0x107   :  { %746 = vst [vmem:[%s1319_s3 + $0x38] sm:$0xff] %v714_v8  ;;  %762 = vst [vmem:[%s1319_s3 + $0xb8] sm:$0xff] %v730_v9  ;;  %v683_v12 = vadd.f32 %v868_v4, %v1186_v54  ;;  %v699_v13 = vadd.f32 %v916_v5, %v1186_v54 }
 0x108   :  { %v870_v10 = vpop.f32.mrf.mxu0  ;;  %v918_v11 = vpop.f32.mrf.mxu1 }
 0x109   :  { %v871_v14 = vadd.f32 %v870_v10, %v869_v6  ;;  %v919_v15 = vadd.f32 %v918_v11, %v917_v7  ;;  %v715_v18 = vmax.f32 %v683_v12, 0.0  ;;  %v731_v19 = vmax.f32 %v699_v13, 0.0 }
 0x10a   :  { %v872_v16 = vpop.f32.mrf.mxu0  ;;  %v920_v17 = vpop.f32.mrf.mxu1 }
 0x10b   :  { %747 = vst [vmem:[%s1319_s3 + $0x40] sm:$0xff] %v715_v18  ;;  %763 = vst [vmem:[%s1319_s3 + $0xc0] sm:$0xff] %v731_v19  ;;  %v684_v22 = vadd.f32 %v871_v14, %v1186_v54  ;;  %v700_v23 = vadd.f32 %v919_v15, %v1186_v54 }
 0x10c   :  { %v873_v20 = vpop.f32.mrf.mxu0  ;;  %v921_v21 = vpop.f32.mrf.mxu1 }
 0x10d   :  { %v874_v24 = vadd.f32 %v873_v20, %v872_v16  ;;  %v922_v25 = vadd.f32 %v921_v21, %v920_v17  ;;  %v716_v28 = vmax.f32 %v684_v22, 0.0  ;;  %v732_v29 = vmax.f32 %v700_v23, 0.0 }
 0x10e   :  { %v875_v26 = vpop.f32.mrf.mxu0  ;;  %v923_v27 = vpop.f32.mrf.mxu1 }
 0x10f   :  { %748 = vst [vmem:[%s1319_s3 + $0x48] sm:$0xff] %v716_v28  ;;  %764 = vst [vmem:[%s1319_s3 + $0xc8] sm:$0xff] %v732_v29  ;;  %v685_v32 = vadd.f32 %v874_v24, %v1186_v54  ;;  %v701_v33 = vadd.f32 %v922_v25, %v1186_v54 }
 0x110   :  { %v876_v30 = vpop.f32.mrf.mxu0  ;;  %v924_v31 = vpop.f32.mrf.mxu1 }
 0x111   :  { %v877_v34 = vadd.f32 %v876_v30, %v875_v26  ;;  %v925_v35 = vadd.f32 %v924_v31, %v923_v27  ;;  %v717_v38 = vmax.f32 %v685_v32, 0.0  ;;  %v733_v39 = vmax.f32 %v701_v33, 0.0 }
 0x112   :  { %v878_v36 = vpop.f32.mrf.mxu0  ;;  %v926_v37 = vpop.f32.mrf.mxu1 }
 0x113   :  { %749 = vst [vmem:[%s1319_s3 + $0x50] sm:$0xff] %v717_v38  ;;  %765 = vst [vmem:[%s1319_s3 + $0xd0] sm:$0xff] %v733_v39  ;;  %v686_v42 = vadd.f32 %v877_v34, %v1186_v54  ;;  %v702_v43 = vadd.f32 %v925_v35, %v1186_v54 }
 0x114   :  { %v879_v40 = vpop.f32.mrf.mxu0  ;;  %v927_v41 = vpop.f32.mrf.mxu1 }
 0x115   :  { %v880_v44 = vadd.f32 %v879_v40, %v878_v36  ;;  %v928_v45 = vadd.f32 %v927_v41, %v926_v37  ;;  %v718_v48 = vmax.f32 %v686_v42, 0.0  ;;  %v734_v49 = vmax.f32 %v702_v43, 0.0 }
 0x116   :  { %v881_v46 = vpop.f32.mrf.mxu0  ;;  %v929_v47 = vpop.f32.mrf.mxu1 }
 0x117   :  { %750 = vst [vmem:[%s1319_s3 + $0x58] sm:$0xff] %v718_v48  ;;  %766 = vst [vmem:[%s1319_s3 + $0xd8] sm:$0xff] %v734_v49  ;;  %v687_v52 = vadd.f32 %v880_v44, %v1186_v54  ;;  %v703_v53 = vadd.f32 %v928_v45, %v1186_v54 }
 0x118   :  { %v882_v50 = vpop.f32.mrf.mxu0  ;;  %v930_v51 = vpop.f32.mrf.mxu1 }
 0x119   :  { %v883_v55 = vadd.f32 %v882_v50, %v881_v46  ;;  %v931_v56 = vadd.f32 %v930_v51, %v929_v47  ;;  %v719_v59 = vmax.f32 %v687_v52, 0.0  ;;  %v735_v60 = vmax.f32 %v703_v53, 0.0 }
 0x11a   :  { %v884_v57 = vpop.f32.mrf.mxu0  ;;  %v932_v58 = vpop.f32.mrf.mxu1 }
 0x11b   :  { %751 = vst [vmem:[%s1319_s3 + $0x60] sm:$0xff] %v719_v59  ;;  %767 = vst [vmem:[%s1319_s3 + $0xe0] sm:$0xff] %v735_v60  ;;  %v688_v63 = vadd.f32 %v883_v55, %v1186_v54  ;;  %v704_v0 = vadd.f32 %v931_v56, %v1186_v54 }
 0x11c   :  { %v885_v61 = vpop.f32.mrf.mxu0  ;;  %v933_v62 = vpop.f32.mrf.mxu1 }
 0x11d   :  { %v886_v1 = vadd.f32 %v885_v61, %v884_v57  ;;  %v934_v2 = vadd.f32 %v933_v62, %v932_v58  ;;  %v720_v5 = vmax.f32 %v688_v63, 0.0  ;;  %v736_v6 = vmax.f32 %v704_v0, 0.0 }
 0x11e   :  { %v887_v3 = vpop.f32.mrf.mxu0  ;;  %v935_v4 = vpop.f32.mrf.mxu1 }
 0x11f   :  { %752 = vst [vmem:[%s1319_s3 + $0x68] sm:$0xff] %v720_v5  ;;  %768 = vst [vmem:[%s1319_s3 + $0xe8] sm:$0xff] %v736_v6  ;;  %v689_v9 = vadd.f32 %v886_v1, %v1186_v54  ;;  %v705_v10 = vadd.f32 %v934_v2, %v1186_v54 }
 0x120   :  { %v888_v7 = vpop.f32.mrf.mxu0  ;;  %v936_v8 = vpop.f32.mrf.mxu1 }
 0x121   :  { %v889_v11 = vadd.f32 %v888_v7, %v887_v3  ;;  %v937_v12 = vadd.f32 %v936_v8, %v935_v4  ;;  %v721_v13 = vmax.f32 %v689_v9, 0.0  ;;  %v737_v14 = vmax.f32 %v705_v10, 0.0 }
 0x123   :  { %753 = vst [vmem:[%s1319_s3 + $0x70] sm:$0xff] %v721_v13  ;;  %769 = vst [vmem:[%s1319_s3 + $0xf0] sm:$0xff] %v737_v14  ;;  %v690_v15 = vadd.f32 %v889_v11, %v1186_v54  ;;  %v706_v16 = vadd.f32 %v937_v12, %v1186_v54 }
 0x125   :  { %v722_v17 = vmax.f32 %v690_v15, 0.0  ;;  %v738_v18 = vmax.f32 %v706_v16, 0.0 }
 0x127   :  { %754 = vst [vmem:[%s1319_s3 + $0x78] sm:$0xff] %v722_v17  ;;  %770 = vst [vmem:[%s1319_s3 + $0xf8] sm:$0xff] %v738_v18 }

</bundles_post_ra>
